<compile_context>
chip_gen: v5e
topology: v5e:2x2
jax: 0.10.0
libtpu: 0.0.40
codegen_flags: <defaults>
</compile_context>

<pallas_src>
import functools

import jax
import jax.numpy as jnp
from jax import lax
from jax.experimental import pallas as pl
from jax.experimental.pallas import tpu as pltpu

LANES = 128
# 8192 rows * 128 lanes * 4 B = 4 MiB per (f32) input per pipeline buffer;
# 2 inputs x 2 buffers = 16 MiB in flight, covered by vmem_limit_bytes below.
MULTI_BLOCK_ROWS = 8192
VMEM_LIMIT_BYTES = 32 * 1024 * 1024


def _dice_partials_kernel(x_ref, t_ref, out_ref, *, block_rows, total_rows,
                          has_tail):
    """Reduce one input block to [sum(x*t), sum(x)+sum(t)] partials."""
    # Cast in-kernel: inputs stay in their native (possibly narrow) dtype
    # over HBM, accumulation is f32.
    x = x_ref[...].astype(jnp.float32)
    t = t_ref[...].astype(jnp.float32)

    xt = x * t      # intersection contribution
    xs = x + t      # sum(inputs) + sum(targets) contribution

    if has_tail:
        # Last block over-covers the array; rows >= `limit` hold undefined
        # data and must be zeroed before BOTH partial sums.  `limit` is
        # >= block_rows for every non-final block, so the mask is all-true
        # there (branchless, pure VPU).
        i = pl.program_id(0)
        limit = total_rows - i * block_rows
        row_ids = lax.broadcasted_iota(jnp.int32, xt.shape, 0)
        valid = row_ids < limit
        xt = jnp.where(valid, xt, 0.0)
        xs = jnp.where(valid, xs, 0.0)

    # One cross-lane reduction per block (negligible next to the HBM stream).
    out_ref[0, 0] = jnp.sum(xt)
    out_ref[0, 1] = jnp.sum(xs)


def dice_loss(inputs, targets, smooth=1.0):
    """Pallas TPU implementation of DiceLoss.forward. Returns a scalar f32.

    Inputs/targets may be any float/int dtype (bf16/int8 recommended for
    large tensors); the kernel casts to f32 internally.
    """
    assert inputs.shape == targets.shape

    x = inputs.reshape(-1)
    t = targets.reshape(-1)
    n = x.shape[0]

    # Lane alignment: the flat length must be a multiple of 128 to view the
    # data as (rows, 128).  Zero padding is sum-safe.  The shipped shape
    # (2048 elems) takes neither branch.
    # TODO(synk): mask the <128-element lane tail in-kernel instead of this
    # O(N) pad copy for lane-ragged sizes.
    if n % LANES:
        pad = LANES - n % LANES
        x = jnp.pad(x, (0, pad))
        t = jnp.pad(t, (0, pad))
        n += pad
    rows = n // LANES

    # Single block for small inputs (block == full array, so no (8,128)
    # divisibility constraint); 8192-row blocks otherwise.  Ragged last
    # blocks are masked in-kernel -- no pad copy.
    block_rows = rows if rows <= MULTI_BLOCK_ROWS else MULTI_BLOCK_ROWS
    nblocks = pl.cdiv(rows, block_rows)
    has_tail = (rows % block_rows) != 0

    x2 = x.reshape(rows, LANES)
    t2 = t.reshape(rows, LANES)

    kernel = functools.partial(
        _dice_partials_kernel,
        block_rows=block_rows,
        total_rows=rows,
        has_tail=has_tail,
    )

    bytes_in = (x2.size * x2.dtype.itemsize) + (t2.size * t2.dtype.itemsize)
    partials = pl.pallas_call(
        kernel,
        out_shape=jax.ShapeDtypeStruct((nblocks, 2), jnp.float32),
        grid=(nblocks,),
        in_specs=[
            pl.BlockSpec((block_rows, LANES), lambda i: (i, 0)),
            pl.BlockSpec((block_rows, LANES), lambda i: (i, 0)),
        ],
        out_specs=pl.BlockSpec(
            (1, 2), lambda i: (i, 0), memory_space=pltpu.MemorySpace.SMEM
        ),
        compiler_params=pltpu.CompilerParams(
            # Blocks are fully independent -> parallel (shards across both
            # TensorCores on v7x; harmless on v5e/v6e).
            dimension_semantics=("parallel",),
            vmem_limit_bytes=VMEM_LIMIT_BYTES,
        ),
        cost_estimate=pl.CostEstimate(
            flops=3 * rows * LANES,
            transcendentals=0,
            bytes_accessed=bytes_in + nblocks * 2 * 4,
        ),
    )(x2, t2)

    # Tiny final combine of per-block partials (O(nblocks) scalars).
    inter = jnp.sum(partials[:, 0])
    s = jnp.sum(partials[:, 1])
    smooth = float(smooth)
    dice = (2.0 * inter + smooth) / (s + smooth)
    return 1.0 - dice


def dice_loss_ref(inputs, targets, smooth=1.0):
    x = inputs.reshape(-1).astype(jnp.float32)
    t = targets.reshape(-1).astype(jnp.float32)
    inter = jnp.sum(x * t)
    dice = (2.0 * inter + smooth) / (jnp.sum(x) + jnp.sum(t) + smooth)
    return 1.0 - dice


if __name__ == "__main__":
    key = jax.random.PRNGKey(0)
    k1, k2 = jax.random.split(key)

    # inputs are expected to be sigmoided probabilities, targets are binary.
    shape = (2, 4, 16, 16)  # NCHW
    inputs = jax.nn.sigmoid(jax.random.normal(k1, shape, dtype=jnp.float32))
    targets = (jax.random.uniform(k2, shape) > 0.5).astype(jnp.float32)

    loss = jax.block_until_ready(dice_loss(inputs, targets, smooth=1.0))
    ref = jax.block_until_ready(dice_loss_ref(inputs, targets, smooth=1.0))

    assert jnp.allclose(loss, ref, rtol=1e-5, atol=1e-6), (loss, ref)
    print("KERNEL_OK")
</pallas_src>

<mosaic_0001>
module attributes {stable_mosaic.version = 11 : i64} {
  func.func @_dice_partials_kernel(%arg0: i32, %arg1: memref<16x128xf32, #tpu.memory_space<vmem>>, %arg2: memref<16x128xf32, #tpu.memory_space<vmem>>, %arg3: memref<1x2xf32, #tpu.memory_space<smem>>) attributes {dimension_semantics = [#tpu.dimension_semantics<parallel>], iteration_bounds = array<i64: 1>, scalar_prefetch = 0 : i64, scratch_operands = 0 : i64, tpu.core_type = #tpu.core_type<tc>, window_params = [{transform_indices = @transform_0, window_bounds = array<i64: 16, 128>}, {transform_indices = @transform_1, window_bounds = array<i64: 16, 128>}, {transform_indices = @transform_2, window_bounds = array<i64: 1, 2>}]} {
    %c0 = arith.constant 0 : index
    %c0_0 = arith.constant 0 : index
    %0 = vector.load %arg1[%c0, %c0_0] : memref<16x128xf32, #tpu.memory_space<vmem>>, vector<16x128xf32>
    %c0_1 = arith.constant 0 : index
    %c0_2 = arith.constant 0 : index
    %1 = vector.load %arg2[%c0_1, %c0_2] : memref<16x128xf32, #tpu.memory_space<vmem>>, vector<16x128xf32>
    %2 = arith.mulf %0, %1 : vector<16x128xf32>
    %3 = arith.addf %0, %1 : vector<16x128xf32>
    %4 = vector.shape_cast %2 : vector<16x128xf32> to vector<1x16x128xf32>
    %cst = arith.constant dense<0.000000e+00> : vector<1xf32>
    %5 = vector.multi_reduction <add>, %4, %cst [1, 2] : vector<1x16x128xf32> to vector<1xf32>
    %6 = vector.shape_cast %5 : vector<1xf32> to vector<1x1x1xf32>
    %7 = vector.extract %6[0, 0, 0] : f32 from vector<1x1x1xf32>
    %c0_3 = arith.constant 0 : index
    %c0_4 = arith.constant 0 : index
    %8 = memref.load %arg3[%c0_3, %c0_4] : memref<1x2xf32, #tpu.memory_space<smem>>
    memref.store %7, %arg3[%c0_3, %c0_4] : memref<1x2xf32, #tpu.memory_space<smem>>
    %9 = vector.shape_cast %3 : vector<16x128xf32> to vector<1x16x128xf32>
    %cst_5 = arith.constant dense<0.000000e+00> : vector<1xf32>
    %10 = vector.multi_reduction <add>, %9, %cst_5 [1, 2] : vector<1x16x128xf32> to vector<1xf32>
    %11 = vector.shape_cast %10 : vector<1xf32> to vector<1x1x1xf32>
    %12 = vector.extract %11[0, 0, 0] : f32 from vector<1x1x1xf32>
    %c0_6 = arith.constant 0 : index
    %c1 = arith.constant 1 : index
    %13 = memref.load %arg3[%c0_6, %c1] : memref<1x2xf32, #tpu.memory_space<smem>>
    memref.store %12, %arg3[%c0_6, %c1] : memref<1x2xf32, #tpu.memory_space<smem>>
    return
  }
  func.func @transform_0(%arg0: i32) -> (i32, i32) {
    %c0_i32 = arith.constant 0 : i32
    %c0_i32_0 = arith.constant 0 : i32
    return %arg0, %c0_i32 : i32, i32
  }
  func.func @transform_1(%arg0: i32) -> (i32, i32) {
    %c0_i32 = arith.constant 0 : i32
    %c0_i32_0 = arith.constant 0 : i32
    return %arg0, %c0_i32 : i32, i32
  }
  func.func @transform_2(%arg0: i32) -> (i32, i32) {
    %c0_i32 = arith.constant 0 : i32
    %c0_i32_0 = arith.constant 0 : i32
    return %arg0, %c0_i32 : i32, i32
  }
}

</mosaic_0001>

<bundles_post_ra>
// kernel: tpu_custom_call.1
= control target key start
LH: loop header
LB: loop body
LE: loop exit
PB: predicated region body
PF: predicated region fallthrough
CT: control target
= control target key end

     0   :  { %7 = vsyncpa [#allocation3], 0  ;;  %s197_s0 = inlined_call_operand.hbm [shape: f32[16,128], index: 0, kind: input, shape index: {}]   ;;  %s198_s1 = inlined_call_operand.hbm [shape: f32[16,128], index: 1, kind: input, shape index: {}]   ;;  %s199_s2 = inlined_call_operand.hbm [shape: f32[1,2], index: 2, kind: output, shape index: {}]  }
   0x1   :  { %8 = vsyncpa [#allocation6], 0 }
   0x2   :  { %9 = vsyncpa [#allocation4], 0  ;;  %s14_s11 = sshll.u32 %s197_s0, 4  ;;  %s168_s12 = smov [#allocation2]   ;;  %s15_s11 = int_to_ptr.hbm [resolvable:$true] %s14_s11 }
   0x3   :  { %s16_s13 = sshll.u32 %s168_s12, 4  ;;  %s27_s16 = sshll.u32 %s198_s1, 4  ;;  %s17_s13 = int_to_ptr.vmem [resolvable:$true] %s16_s13  ;;  %s28_s16 = int_to_ptr.hbm [resolvable:$true] %s27_s16 }
   0x4   :  { %s169_s17 = smov 128   ;;  %s170_s18 = smov 8  }
   0x5   :  { %22 = dma.hbm_to_vmem [thread:$0]  %s15_s11, 256, %s17_s13, [#allocation3], %s169_s17, %s169_s17, %s170_s18  }
   0x6   :  { %s171_s19 = smov [#allocation5]  }
   0x7   :  { %s29_s20 = sshll.u32 %s171_s19, 4  ;;  %s30_s20 = int_to_ptr.vmem [resolvable:$true] %s29_s20 }
   0x8   :  { %35 = dma.hbm_to_vmem [thread:$0]  %s28_s16, 256, %s30_s20, [#allocation6], %s169_s17, %s169_s17, %s170_s18  }
   0x9   :  { %162 = dma.done.wait [#allocation3], 256  }
   0xa   :  { %163 = vsyncadd [#allocation3], 4294967040 }
   0xb   :  { %164 = dma.done.wait [#allocation6], 256  }
   0xc   :  { %165 = vsyncadd [#allocation6], 4294967040  ;;  %v44_v0 = vld [vmem:[#allocation2] sm:$0xff]  ;;  %v45_v1 = vld [vmem:[#allocation2 + $0x8] sm:$0xff]  ;;  %s81_s22 = sshll.u32 %s199_s2, 4  ;;  %s172_s24 = smov [#allocation7]   ;;  %s82_s22 = int_to_ptr.hbm [resolvable:$true] %s81_s22 }
   0xd   :  { %v46_v2 = vld [vmem:[#allocation5] sm:$0xff]  ;;  %v47_v3 = vld [vmem:[#allocation5 + $0x8] sm:$0xff] }
   0xe   :  { %v48_v4 = vmul.f32 %v46_v2, %v44_v0  ;;  %v49_v5 = vmul.f32 %v47_v3, %v45_v1  ;;  %v50_v7 = vadd.f32 %v46_v2, %v44_v0  ;;  %v51_v8 = vadd.f32 %v47_v3, %v45_v1 }
  0x10   :  { %v52_v6 = vadd.f32 %v49_v5, %v48_v4  ;;  %v64_v9 = vadd.f32 %v51_v8, %v50_v7 }
  0x12   :  { %53 = vadd.xlane.f32.xlu0 %v52_v6 }
  0x1a   :  { %65 = vadd.xlane.f32.xlu0 %v64_v9 }
  0x85   :  { %v54_v10 = vpop.xlane.xlu0 %53 }
  0x86   :  { %v55_v11 = vrot.slane %v54_v10, 4 }
  0x88   :  { %v56_v12 = vadd.f32 %v55_v11, %v54_v10 }
  0x8a   :  { %v57_v13 = vrot.slane %v56_v12, 2 }
  0x8c   :  { %v58_v14 = vadd.f32 %v57_v13, %v56_v12 }
  0x8d   :  { %v66_v15 = vpop.xlane.xlu0 %65 }
  0x8e   :  { %v67_v16 = vrot.slane %v66_v15, 4  ;;  %v59_v17 = vrot.slane %v58_v14, 1 }
  0x90   :  { %v68_v18 = vadd.f32 %v67_v16, %v66_v15  ;;  %v60_v19 = vadd.f32 %v59_v17, %v58_v14 }
  0x92   :  { %v69_v20 = vrot.slane %v68_v18, 2  ;;  %93 = vpush %v60_v19 }
  0x94   :  { %v70_v21 = vadd.f32 %v69_v20, %v68_v18 }
  0x96   :  { %v71_v22 = vrot.slane %v70_v21, 1 }
  0x98   :  { %v72_v23 = vadd.f32 %v71_v22, %v70_v21 }
  0x9a   :  { %95 = vpush %v72_v23 }
  0xc3   :  { %s94_s0 = spop %93 }
  0xc4   :  { %63 = sst [smem:[#allocation7]] %s94_s0 }
  0xcb   :  { %s96_s23 = spop %95 }
  0xcc   :  { %75 = sst [smem:[#allocation7 + $0x1]] %s96_s23 }
  0xcd   :  { %84 = dma.smem_to_hbm %s172_s24, 16, %s82_s22, [#allocation4]  }
  0xce   :  { %166 = dma.done.wait [#allocation4], 16  }
  0xcf   :  { %167 = vsyncadd [#allocation4], 4294967280 }
  0xd0   :  { %89 = sfence }
  0xd1   :  { %90 = vsyncpa [#allocation3], 1 }
  0xd2   :  { %91 = vsyncpa [#allocation6], 1 }
  0xd3   :  { %92 = vsyncpa [#allocation4], 1 }

</bundles_post_ra>
